<compile_context>
chip_gen: v7x
topology: tpu7x:2x2x1
jax: 0.10.0
libtpu: 0.0.40
codegen_flags: <defaults>
</compile_context>

<pallas_src>
import functools

import jax
import jax.numpy as jnp
from jax.experimental import pallas as pl
from jax.experimental.pallas import tpu as pltpu


# -----------------------------------------------------------------------------
# Kernel
# -----------------------------------------------------------------------------
def _shift_zero(x, s, axis, idx, extent):
    """out[i] = x[i + s] along `axis`, with zeros outside [0, extent)."""
    if s == 0:
        return x
    rolled = pltpu.roll(x, shift=(-s) % extent, axis=axis)   # XLU rotation
    valid = jnp.logical_and(idx + s >= 0, idx + s < extent)  # zero-pad boundary
    return jnp.where(valid, rolled, jnp.zeros_like(rolled))


def _blur_kernel(x_ref, o_ref, *, taps, pad):
    # x_ref / o_ref: VMEM (TB, H, W).  W = lanes, H = sublanes, channels lead.
    x = x_ref[...]                              # single load, native dtype
    _, H, W = x.shape
    K = len(taps)

    h_idx = jax.lax.broadcasted_iota(jnp.int32, x.shape, 1)
    w_idx = jax.lax.broadcasted_iota(jnp.int32, x.shape, 2)

    # Horizontal pass (W = lane axis): K lane rotations + K multiply-adds.
    acc = taps[0] * _shift_zero(x, 0 - pad, 2, w_idx, W)
    for d in range(1, K):
        acc = acc + taps[d] * _shift_zero(x, d - pad, 2, w_idx, W)

    # Vertical pass (H = sublane axis) on the horizontal result.  Zero-padding
    # the intermediate vertically is equivalent to zero-padding the input
    # (horizontal blur of a zero row is zero).
    out = taps[0] * _shift_zero(acc, 0 - pad, 1, h_idx, H)
    for d in range(1, K):
        out = out + taps[d] * _shift_zero(acc, d - pad, 1, h_idx, H)

    o_ref[...] = out.astype(o_ref.dtype)


# -----------------------------------------------------------------------------
# Host-side helpers
# -----------------------------------------------------------------------------
def make_blur_taps(kernel=None, normalize=True, flip=False):
    """1-D taps t such that t ⊗ t equals BlurLayer's (normalized/flipped) 2-D buffer."""
    if kernel is None:
        kernel = [1, 2, 1]
    # The module builds its 2-D kernel as k ⊗ k from a 1-D kernel; a nested
    # (2-D) kernel would raise here instead of silently producing wrong output.
    k = [float(v) for v in kernel]
    if flip:
        k = k[::-1]
    if normalize:
        s = sum(k)                              # sum(k ⊗ k) == s * s
        k = [v / s for v in k]
    return tuple(k)


def _cdiv(a, b):
    return -(-a // b)


def _vmem_budget_bytes():
    try:
        cap = int(pltpu.get_tpu_info().vmem_capacity_bytes)
    except Exception:
        cap = 64 * 1024 * 1024                  # assume smallest (v7x-class) VMEM
    return min((cap * 3) // 4, 96 * 1024 * 1024)


# -----------------------------------------------------------------------------
# Public forward pass (matches BlurLayer.forward semantics; x is NCHW)
# -----------------------------------------------------------------------------
def blur_layer(x, kernel=None, normalize=True, flip=False, stride=1):
    N, C, H, W = x.shape
    taps = make_blur_taps(kernel, normalize, flip)
    K = len(taps)
    pad = (K - 1) // 2
    Hs = H + 2 * pad - (K - 1)                  # stride-1 output extents
    Ws = W + 2 * pad - (K - 1)
    NC = N * C

    x3 = x.reshape(NC, H, W)                    # free reshape: no HBM copy

    # Channel-block size from the device VMEM budget.  Per-step live set is
    # roughly (in + out) double-buffered plus a few tile-sized temporaries ~ 8x
    # the block bytes.
    budget = _vmem_budget_bytes()
    per_chan = max(1, H * W * x.dtype.itemsize)
    tb = max(1, (budget // 8) // per_chan)
    if NC >= 2:
        tb = min(tb, _cdiv(NC, 2))              # >= 2 grid steps (v7x has 2 TCs)
    tb = min(tb, NC)
    grid = (_cdiv(NC, tb),)

    flops = 2 * (2 * K) * NC * H * W            # two separable K-tap passes
    bytes_accessed = 2 * NC * H * W * x.dtype.itemsize

    out3 = pl.pallas_call(
        functools.partial(_blur_kernel, taps=taps, pad=pad),
        out_shape=jax.ShapeDtypeStruct((NC, H, W), x.dtype),
        grid=grid,
        in_specs=[pl.BlockSpec((tb, H, W), lambda c: (c, 0, 0))],
        out_specs=pl.BlockSpec((tb, H, W), lambda c: (c, 0, 0)),
        compiler_params=pltpu.CompilerParams(
            dimension_semantics=("parallel",),
            vmem_limit_bytes=budget),
        cost_estimate=pl.CostEstimate(
            flops=flops, transcendentals=0, bytes_accessed=bytes_accessed),
    )(x3)

    if (Hs, Ws) != (H, W):                      # only hit for even-K kernels
        out3 = out3[:, :Hs, :Ws]
    out = out3.reshape(N, C, Hs, Ws)
    if stride != 1:
        # TODO(synk): move the ::stride selection into the kernel's store.
        out = out[:, :, ::stride, ::stride]
    return out


# -----------------------------------------------------------------------------
# Plain-JAX reference, built exactly like the PyTorch module's buffer
# -----------------------------------------------------------------------------
def _reference_blur(x, kernel=None, normalize=True, flip=False, stride=1):
    if kernel is None:
        kernel = [1, 2, 1]
    k = jnp.asarray(kernel, dtype=jnp.float32)
    k2d = k[:, None] * k[None, :]
    if normalize:
        k2d = k2d / jnp.sum(k2d)
    if flip:
        k2d = k2d[::-1, ::-1]
    N, C, H, W = x.shape
    K = k2d.shape[0]
    pad = (K - 1) // 2
    w = jnp.broadcast_to(k2d[None, None], (C, 1, K, K))  # OIHW, groups=C
    return jax.lax.conv_general_dilated(
        x, w, window_strides=(stride, stride),
        padding=[(pad, pad), (pad, pad)],
        dimension_numbers=("NCHW", "OIHW", "NCHW"), feature_group_count=C)


if __name__ == "__main__":
    key = jax.random.PRNGKey(0)
    N, C, H, W = 2, 4, 16, 16
    x = jax.random.normal(key, (N, C, H, W), dtype=jnp.float32)

    out = jax.block_until_ready(blur_layer(x, stride=1))
    ref = jax.block_until_ready(_reference_blur(x, stride=1))

    assert out.shape == ref.shape == (N, C, H, W)
    assert jnp.allclose(out, ref, atol=1e-5, rtol=1e-5), "mismatch vs reference conv"
    print("KERNEL_OK")
</pallas_src>

<mosaic_0001>
module attributes {stable_mosaic.version = 11 : i64} {
  func.func @_blur_kernel(%arg0: i32, %arg1: memref<4x16x16xf32, #tpu.memory_space<vmem>>, %arg2: memref<4x16x16xf32, #tpu.memory_space<vmem>>) attributes {dimension_semantics = [#tpu.dimension_semantics<parallel>], iteration_bounds = array<i64: 2>, scalar_prefetch = 0 : i64, scratch_operands = 0 : i64, tpu.core_type = #tpu.core_type<tc>, window_params = [{transform_indices = @transform_0, window_bounds = array<i64: 4, 16, 16>}, {transform_indices = @transform_1, window_bounds = array<i64: 4, 16, 16>}]} {
    %c0 = arith.constant 0 : index
    %c0_0 = arith.constant 0 : index
    %c0_1 = arith.constant 0 : index
    %0 = vector.load %arg1[%c0, %c0_0, %c0_1] : memref<4x16x16xf32, #tpu.memory_space<vmem>>, vector<4x16x16xf32>
    %1 = tpu.iota {dimensions = array<i32: 1>} : vector<4x16x16xi32>
    %2 = tpu.iota {dimensions = array<i32: 2>} : vector<4x16x16xi32>
    %c1_i32 = arith.constant 1 : i32
    %3 = tpu.dynamic_rotate %0 by %c1_i32 dim 2 : vector<4x16x16xf32>, i32 -> vector<4x16x16xf32>
    %c-1_i32 = arith.constant -1 : i32
    %4 = vector.broadcast %c-1_i32 : i32 to vector<4x16x16xi32>
    %5 = arith.addi %2, %4 : vector<4x16x16xi32>
    %c0_i32 = arith.constant 0 : i32
    %6 = vector.broadcast %c0_i32 : i32 to vector<4x16x16xi32>
    %7 = arith.cmpi sge, %5, %6 : vector<4x16x16xi32>
    %c-1_i32_2 = arith.constant -1 : i32
    %8 = vector.broadcast %c-1_i32_2 : i32 to vector<4x16x16xi32>
    %9 = arith.addi %2, %8 : vector<4x16x16xi32>
    %c16_i32 = arith.constant 16 : i32
    %10 = vector.broadcast %c16_i32 : i32 to vector<4x16x16xi32>
    %11 = arith.cmpi slt, %9, %10 : vector<4x16x16xi32>
    %12 = arith.andi %7, %11 : vector<4x16x16xi1>
    %cst = arith.constant 0.000000e+00 : f32
    %13 = vector.broadcast %cst : f32 to vector<4x16x16xf32>
    %14 = arith.select %12, %3, %13 : vector<4x16x16xi1>, vector<4x16x16xf32>
    %cst_3 = arith.constant 2.500000e-01 : f32
    %15 = vector.broadcast %cst_3 : f32 to vector<4x16x16xf32>
    %16 = arith.mulf %15, %14 : vector<4x16x16xf32>
    %cst_4 = arith.constant 5.000000e-01 : f32
    %17 = vector.broadcast %cst_4 : f32 to vector<4x16x16xf32>
    %18 = arith.mulf %17, %0 : vector<4x16x16xf32>
    %19 = arith.addf %16, %18 : vector<4x16x16xf32>
    %c15_i32 = arith.constant 15 : i32
    %20 = tpu.dynamic_rotate %0 by %c15_i32 dim 2 : vector<4x16x16xf32>, i32 -> vector<4x16x16xf32>
    %c1_i32_5 = arith.constant 1 : i32
    %21 = vector.broadcast %c1_i32_5 : i32 to vector<4x16x16xi32>
    %22 = arith.addi %2, %21 : vector<4x16x16xi32>
    %c0_i32_6 = arith.constant 0 : i32
    %23 = vector.broadcast %c0_i32_6 : i32 to vector<4x16x16xi32>
    %24 = arith.cmpi sge, %22, %23 : vector<4x16x16xi32>
    %c1_i32_7 = arith.constant 1 : i32
    %25 = vector.broadcast %c1_i32_7 : i32 to vector<4x16x16xi32>
    %26 = arith.addi %2, %25 : vector<4x16x16xi32>
    %c16_i32_8 = arith.constant 16 : i32
    %27 = vector.broadcast %c16_i32_8 : i32 to vector<4x16x16xi32>
    %28 = arith.cmpi slt, %26, %27 : vector<4x16x16xi32>
    %29 = arith.andi %24, %28 : vector<4x16x16xi1>
    %cst_9 = arith.constant 0.000000e+00 : f32
    %30 = vector.broadcast %cst_9 : f32 to vector<4x16x16xf32>
    %31 = arith.select %29, %20, %30 : vector<4x16x16xi1>, vector<4x16x16xf32>
    %cst_10 = arith.constant 2.500000e-01 : f32
    %32 = vector.broadcast %cst_10 : f32 to vector<4x16x16xf32>
    %33 = arith.mulf %32, %31 : vector<4x16x16xf32>
    %34 = arith.addf %19, %33 : vector<4x16x16xf32>
    %c1_i32_11 = arith.constant 1 : i32
    %35 = tpu.dynamic_rotate %34 by %c1_i32_11 dim 1 : vector<4x16x16xf32>, i32 -> vector<4x16x16xf32>
    %c-1_i32_12 = arith.constant -1 : i32
    %36 = vector.broadcast %c-1_i32_12 : i32 to vector<4x16x16xi32>
    %37 = arith.addi %1, %36 : vector<4x16x16xi32>
    %c0_i32_13 = arith.constant 0 : i32
    %38 = vector.broadcast %c0_i32_13 : i32 to vector<4x16x16xi32>
    %39 = arith.cmpi sge, %37, %38 : vector<4x16x16xi32>
    %c-1_i32_14 = arith.constant -1 : i32
    %40 = vector.broadcast %c-1_i32_14 : i32 to vector<4x16x16xi32>
    %41 = arith.addi %1, %40 : vector<4x16x16xi32>
    %c16_i32_15 = arith.constant 16 : i32
    %42 = vector.broadcast %c16_i32_15 : i32 to vector<4x16x16xi32>
    %43 = arith.cmpi slt, %41, %42 : vector<4x16x16xi32>
    %44 = arith.andi %39, %43 : vector<4x16x16xi1>
    %cst_16 = arith.constant 0.000000e+00 : f32
    %45 = vector.broadcast %cst_16 : f32 to vector<4x16x16xf32>
    %46 = arith.select %44, %35, %45 : vector<4x16x16xi1>, vector<4x16x16xf32>
    %cst_17 = arith.constant 2.500000e-01 : f32
    %47 = vector.broadcast %cst_17 : f32 to vector<4x16x16xf32>
    %48 = arith.mulf %47, %46 : vector<4x16x16xf32>
    %cst_18 = arith.constant 5.000000e-01 : f32
    %49 = vector.broadcast %cst_18 : f32 to vector<4x16x16xf32>
    %50 = arith.mulf %49, %34 : vector<4x16x16xf32>
    %51 = arith.addf %48, %50 : vector<4x16x16xf32>
    %c15_i32_19 = arith.constant 15 : i32
    %52 = tpu.dynamic_rotate %34 by %c15_i32_19 dim 1 : vector<4x16x16xf32>, i32 -> vector<4x16x16xf32>
    %c1_i32_20 = arith.constant 1 : i32
    %53 = vector.broadcast %c1_i32_20 : i32 to vector<4x16x16xi32>
    %54 = arith.addi %1, %53 : vector<4x16x16xi32>
    %c0_i32_21 = arith.constant 0 : i32
    %55 = vector.broadcast %c0_i32_21 : i32 to vector<4x16x16xi32>
    %56 = arith.cmpi sge, %54, %55 : vector<4x16x16xi32>
    %c1_i32_22 = arith.constant 1 : i32
    %57 = vector.broadcast %c1_i32_22 : i32 to vector<4x16x16xi32>
    %58 = arith.addi %1, %57 : vector<4x16x16xi32>
    %c16_i32_23 = arith.constant 16 : i32
    %59 = vector.broadcast %c16_i32_23 : i32 to vector<4x16x16xi32>
    %60 = arith.cmpi slt, %58, %59 : vector<4x16x16xi32>
    %61 = arith.andi %56, %60 : vector<4x16x16xi1>
    %cst_24 = arith.constant 0.000000e+00 : f32
    %62 = vector.broadcast %cst_24 : f32 to vector<4x16x16xf32>
    %63 = arith.select %61, %52, %62 : vector<4x16x16xi1>, vector<4x16x16xf32>
    %cst_25 = arith.constant 2.500000e-01 : f32
    %64 = vector.broadcast %cst_25 : f32 to vector<4x16x16xf32>
    %65 = arith.mulf %64, %63 : vector<4x16x16xf32>
    %66 = arith.addf %51, %65 : vector<4x16x16xf32>
    %c0_26 = arith.constant 0 : index
    %c0_27 = arith.constant 0 : index
    %c0_28 = arith.constant 0 : index
    %67 = vector.load %arg2[%c0_26, %c0_27, %c0_28] : memref<4x16x16xf32, #tpu.memory_space<vmem>>, vector<4x16x16xf32>
    tpu.vector_store %arg2[%c0_26, %c0_27, %c0_28], %66 {strides = array<i32>} : memref<4x16x16xf32, #tpu.memory_space<vmem>>, vector<4x16x16xf32>,
    return
  }
  func.func @transform_0(%arg0: i32) -> (i32, i32, i32) {
    %c0_i32 = arith.constant 0 : i32
    %c0_i32_0 = arith.constant 0 : i32
    %c0_i32_1 = arith.constant 0 : i32
    return %arg0, %c0_i32, %c0_i32_0 : i32, i32, i32
  }
  func.func @transform_1(%arg0: i32) -> (i32, i32, i32) {
    %c0_i32 = arith.constant 0 : i32
    %c0_i32_0 = arith.constant 0 : i32
    %c0_i32_1 = arith.constant 0 : i32
    return %arg0, %c0_i32, %c0_i32_0 : i32, i32, i32
  }
}

</mosaic_0001>

<bundles_post_ra>
// kernel: tpu_custom_call.1
= control target key start
LH: loop header
LB: loop body
LE: loop exit
PB: predicated region body
PF: predicated region fallthrough
CT: control target
= control target key end

     0   :  { %6 = vsyncpa [#allocation3], 0  ;;  %s1083_s0 = inlined_call_operand.hbm [shape: f32[8,16,16], index: 0, kind: input, shape index: {}]   ;;  %s1084_s1 = inlined_call_operand.hbm [shape: f32[8,16,16], index: 1, kind: output, shape index: {}]  }
   0x1   :  { %8 = vsyncpa [#allocation3 + $0x1], 0 }
   0x2   :  { %9 = vsyncpa [#allocation4], 0 }
   0x3   :  { %11 = vsyncpa [#allocation4 + $0x1], 0  ;;  %s713_s6 = smov 0   ;;  %s715_s7 = smov 0  }
   0x4   :  { %s717_s8 = smov 0   ;;  %s719_s9 = smov 0  }
   0x5 LB: > { %s734_s10 = sadd.s32 4294967295, %s692_s9   ;;  %s523_s11 = sadd.s32 4294967294, %s692_s9   ;;  %s692_s9 = sphi %s719_s9, %s1099_s9   ;;  %s688_s8 = sphi %s717_s8, %s1098_s8   ;;  %s684_s7 = sphi %s715_s7, %s1097_s7   ;;  %s680_s6 = sphi %s713_s6, %s1096_s6  }
   0x6   : > { %s738_s12 = sadd.s32 1, %s692_s9   ;;  %s24_s13 = sadd.s32 1, %s688_s8 }
   0x7   : > { %s21_s14 = ssub.s32 %s692_s9, %s738_s12  ;;  %p31_p0 = scmp.ne.s32.totalorder %s688_s8, %s684_s7 }
   0x8   : > { %p22_p1 = scmp.eq.s32.totalorder %s21_s14, 0  ;;  %p32_p2 = scmp.eq.s32.totalorder %s692_s9, 0 }
   0x9   : > { %p37_p3 = scmp.ne.s32.totalorder %s684_s7, %s680_s6  ;;  %p38_p4 = scmp.eq.s32.totalorder %s734_s10, 0 }
   0xa   : > { %s750_s15 = scalar_select %p22_p1, %s688_s8, %s24_s13  }
   0xb   : > { %p752_p5 = por %p32_p2, %p31_p0  ;;  %p756_p6 = por %p38_p4, %p37_p3 }
   0xc   : > { %p61_p7 = scmp.eq.s32.totalorder %s734_s10, 1  ;;  %p67_p8 = scmp.eq.s32.totalorder %s523_s11, 1 }
   0xd   : > { %p555_p10 = scmp.lt.s32.totalorder %s692_s9, 2  ;;  %s87_s20 = sand.u32 1, %s688_s8  }
   0xe   : > { %p763_p11 = por %p61_p7, %p31_p0  ;;  %p767_p12 = por %p67_p8, %p37_p3 }
   0xf   : > { %s540_s21 = sshll.u32 %s692_s9, 10  ;;  %s526_s22 = sshll.u32 %s87_s20, 6 }
  0x10   : > { %s1088_s18 = scalar_select %p763_p11, 1, 0 }
  0x11   : > { %s1089_s19 = scalar_select %p767_p12, 1, 0 }
  0x12   : > { %s776_s25 = scalar_lea.hbm %s1083_s0, %s540_s21  ;;  %s91_s26 = scalar_lea.vmem [#allocation2], %s526_s22 }
  0x13   : > { %s99_s27 = sshll.u32 %s91_s26, 4  ;;  %p780_p13 = pnand %p555_p10, %p752_p5  ;;  %s784_s27 = int_to_ptr.vmem [resolvable:$true] %s99_s27 }
  0x14   : > { %s786_s29 = scalar_lea.sflag [#allocation3], %s87_s20  ;;  %s596_s30 = scalar_lea.hbm %s776_s25, 1024 }
  0x15   : > { %p597_p0 = scmp.ne.s32.totalorder %s776_s25, %s596_s30  ;;  %p598_p1 = pneg %p780_p13 }
  0x16   : > { %s601_s4 = scalar_lea.hbm %s1083_s0, 2048  ;;  %p602_p4 = scmp.lt.u32.totalorder %s776_s25, %s1083_s0 }
  0x17   : > { %p599_p2 = pnand %p598_p1, %p597_p0  ;;  %p603_p5 = scmp.lt.u32.totalorder %s601_s4, %s596_s30 }
  0x18   : > { %p605_p8 = scmp.lt.u32.totalorder %s596_s30, %s776_s25 }
  0x19   : > { %p600_p3 = pneg %p599_p2  ;;  %p604_p7 = por %p603_p5, %p602_p4 }
  0x1b   : > { %p606_p10 = por %p605_p8, %p604_p7 }
  0x1d   : > { %p607_p9 = pnand %p606_p10, %p600_p3 }
  0x1f   : > { %610 = shalt.err (!%p607_p9)
}
  0x20   : > { %s611_s13 = scalar_lea.vmem %s784_s27, 1024  ;;  %s694_s14 = smov [#allocation2]  }
  0x21   : > { %p612_p0 = scmp.ne.s32.totalorder %s784_s27, %s611_s13  ;;  %s616_s16 = sshll.u32 %s694_s14, 4  ;;  %s617_s16 = int_to_ptr.vmem [resolvable:$false] %s616_s16 }
  0x22   : > { %s618_s20 = scalar_lea.vmem %s617_s16, 2048  ;;  %p619_p11 = scmp.lt.s32.totalorder %s784_s27, %s617_s16 }
  0x23   : > { %p614_p2 = pnand %p612_p0, %p598_p1  ;;  %p620_p4 = scmp.lt.s32.totalorder %s618_s20, %s611_s13 }
  0x25   : > { %p615_p12 = pneg %p614_p2  ;;  %p621_p5 = por %p620_p4, %p619_p11 }
  0x27   : > { %p622_p7 = pnand %p621_p5, %p615_p12 }
  0x29   : > { %625 = shalt.err (!%p622_p7)
}
  0x2a   : > { %s695_s21 = smov 128   ;;  %s696_s22 = smov 8  }
  0x2b   : > { %550 = dma.hbm_to_vmem [thread:$0]  (!%p780_p13), %s776_s25, 1024, %s784_s27, %s786_s29, %s695_s21, %s695_s21, %s696_s22  }
  0x2c   : > { %p530_p9 = scmp.ge.s32.totalorder %s692_s9, 1  ;;  %p107_p1 = scmp.lt.s32.totalorder %s692_s9, 3 }
  0x2e   : > { %p108_p3 = pnand %p530_p9, %p107_p1 }
  0x2f   : > { %s817_s23 = sand.u32 (!%p108_p3), 1, %s684_s7  }
  0x30   : > { %111 = sbr.rel (%p108_p3) target bundleno = 470 (0x1d6), region = 24  ;;  %s531_s24 = sshll.u32 (!%p108_p3), %s817_s23, 6 }
  0x31   : > { %s114_s26 = scalar_lea.sflag (!%p108_p3), [#allocation3], %s817_s23  ;;  %s117_s30 = scalar_lea.vmem (!%p108_p3), [#allocation2], %s531_s24 }
  0x37   : > { %671 = dma.done.wait (%p756_p6), %s114_s26, 1024  }
  0x38   : > { %673 = vsyncadd (%p756_p6), %s114_s26, 4294966272  ;;  %v827_v0 = vld [vmem:[%s117_s30] sm:$0xff]  ;;  %v829_v1 = vld [vmem:[%s117_s30 + $0x10] sm:$0xff]  ;;  %s697_s25 = smov 16   ;;  %vm151_vm0 = vcmask 1047680   ;;  %s698_s17 = smov 113   ;;  %v146_v40 = vlaneseq }
  0x39   : > { %152 = vrot.lane.b32.xlu0 %v827_v0, %s697_s25  ;;  %158 = vrot.lane.b32.xlu1 %v829_v1, %s697_s25  ;;  %v835_v2 = vld [vmem:[%s117_s30 + $0x8] sm:$0xff]  ;;  %v837_v3 = vld [vmem:[%s117_s30 + $0x18] sm:$0xff]  ;;  %s699_s27 = smov 127   ;;  %v252_v54 = vmul.f32 0.5, %v827_v0  ;;  %v254_v59 = vmul.f32 0.5, %v829_v1  ;;  %vm426_vm9 = vcmask 130048  }
  0x3a   : > { %v843_v4 = vld [vmem:[%s117_s30 + $0x20] sm:$0xff]  ;;  %v845_v5 = vld [vmem:[%s117_s30 + $0x28] sm:$0xff]  ;;  %v851_v6 = vld [vmem:[%s117_s30 + $0x30] sm:$0xff]  ;;  %v150_v41 = vand.u32 127, %v146_v40  ;;  %v905_v50 = vshrl.u32 %v146_v40, 7  ;;  %v253_v56 = vmul.f32 0.5, %v835_v2 }
  0x3b   : > { %v853_v7 = vld [vmem:[%s117_s30 + $0x38] sm:$0xff]  ;;  %v255_v61 = vmul.f32 0.5, %v837_v3  ;;  %v256_v62 = vmul.f32 0.5, %v843_v4  ;;  %s978_s28 = scalar_lea.vmem [#allocation5], %s531_s24  ;;  %s542_s29 = sshll.u32 %s734_s10, 10 }
  0x3c   : > { %v200_v43 = vadd.s32 4294967295, %v150_v41  ;;  %v903_v49 = vadd.s32 1, %v150_v41  ;;  %v148_v58 = vadd.s32 8, %v905_v50  ;;  %vm328_vm5 = vcmp.lt.s32.totalorder %v905_v50, 1  ;;  %s450_s2 = sshll.u32 %s978_s28, 4  ;;  %s1033_s5 = scalar_lea.hbm %s1084_s1, %s542_s29  ;;  %s1035_s2 = int_to_ptr.vmem [resolvable:$true] %s450_s2 }
  0x3d   : > { %155 = vrot.lane.b32.xlu0 %v835_v2, %s697_s25  ;;  %161 = vrot.lane.b32.xlu1 %v837_v3, %s697_s25  ;;  %vm385_vm6 = vcmp.lt.s32.totalorder %v905_v50, 7  ;;  %s436_s10 = scalar_lea.sflag [#allocation4], %s817_s23  ;;  %s626_s11 = scalar_lea.vmem %s1035_s2, 1024 }
  0x3e   : > { %vm201_vm1 = vcmp.ge.s32.totalorder %v200_v43, 0  ;;  %vm202_vm2 = vcmp.lt.s32.totalorder %v200_v43, 16  ;;  %vm270_vm4 = vcmp.lt.s32.totalorder %v903_v49, 16  ;;  %p627_p6 = scmp.ne.s32.totalorder %s1035_s2, %s626_s11  ;;  %p1093_p11 = scmp.ne.s32.totalorder %s1088_s18, 0 }
  0x3f   : > { %vm899_vm3 = vmand %vm201_vm1, %vm202_vm2  ;;  %s700_s13 = smov [#allocation5]  }
  0x40   : > { %p628_p12 = pnand %p627_p6, %p1093_p11  ;;  %s630_s14 = sshll.u32 %s700_s13, 4  ;;  %s631_s14 = int_to_ptr.vmem [resolvable:$false] %s630_s14 }
  0x41   : > { %164 = vrot.lane.b32.xlu0 %v843_v4, %s697_s25  ;;  %167 = vrot.lane.b32.xlu1 %v845_v5, %s697_s25  ;;  %s632_s16 = scalar_lea.vmem %s631_s14, 2048  ;;  %p633_p8 = scmp.lt.s32.totalorder %s1035_s2, %s631_s14 }
  0x42   : > { %p629_p13 = pneg %p628_p12  ;;  %p634_p10 = scmp.lt.s32.totalorder %s632_s16, %s626_s11 }
  0x44   : > { %p635_p0 = por %p634_p10, %p633_p8 }
  0x45   : > { %170 = vrot.lane.b32.xlu0 %v851_v6, %s697_s25  ;;  %173 = vrot.lane.b32.xlu1 %v853_v7, %s697_s25 }
  0x46   : > { %p636_p2 = pnand %p635_p0, %p629_p13 }
  0xab   : > { %v153_v8 = vpop.permute.xlu0 %152  ;;  %v159_v9 = vpop.permute.xlu1 %158 }
  0xac   : > { %v154_v10 = vsel %vm151_vm0, %v153_v8, %v827_v0  ;;  %v160_v11 = vsel %vm151_vm0, %v159_v9, %v829_v1  ;;  %v257_v9 = vmul.f32 0.5, %v845_v5 }
  0xad   : > { %176 = vrot.lane.b32.xlu0 %v154_v10, %s697_s25 }
  0xaf   : > { %v156_v12 = vpop.permute.xlu0 %155  ;;  %v162_v13 = vpop.permute.xlu1 %161 }
  0xb0   : > { %v157_v14 = vsel %vm151_vm0, %v156_v12, %v835_v2  ;;  %v163_v15 = vsel %vm151_vm0, %v162_v13, %v837_v3 }
  0xb1   : > { %180 = vrot.lane.b32.xlu0 %v160_v11, %s697_s25  ;;  %178 = vrot.lane.b32.xlu1 %v157_v14, %s697_s25  ;;  %v928_v11 = vmul.f32 0.5, %v851_v6  ;;  %v934_v14 = vmul.f32 0.5, %v853_v7 }
  0xb3   : > { %v165_v16 = vpop.permute.xlu0 %164  ;;  %v168_v17 = vpop.permute.xlu1 %167 }
  0xb4   : > { %v166_v18 = vsel %vm151_vm0, %v165_v16, %v843_v4  ;;  %v169_v19 = vsel %vm151_vm0, %v168_v17, %v845_v5 }
  0xb5   : > { %182 = vrot.lane.b32.xlu1 %v163_v15, %s697_s25  ;;  %184 = vrot.lane.b32.xlu0 %v166_v18, %s697_s25  ;;  %v936_v15 = vadd.s32 1, %v148_v58 }
  0xb7   : > { %v171_v20 = vpop.permute.xlu0 %170  ;;  %v174_v21 = vpop.permute.xlu1 %173  ;;  %vm399_vm8 = vcmp.lt.s32.totalorder %v936_v15, 16 }
  0xb8   : > { %v172_v22 = vsel %vm151_vm0, %v171_v20, %v851_v6  ;;  %v175_v23 = vsel %vm151_vm0, %v174_v21, %v853_v7 }
  0xb9   : > { %186 = vrot.lane.b32.xlu1 %v169_v19, %s697_s25  ;;  %188 = vrot.lane.b32.xlu0 %v172_v22, %s697_s25 }
  0xbd   : > { %190 = vrot.lane.b32.xlu1 %v175_v23, %s697_s25 }
 0x11f   : > { %v177_v24 = vpop.permute.xlu0 %176 }
 0x120   : > { %v192_v25 = vsel %vm151_vm0, %v177_v24, %v827_v0 }
 0x121   : > { %212 = vrot.lane.b32.xlu0 %v192_v25, %s698_s17 }
 0x123   : > { %v179_v26 = vpop.permute.xlu1 %178  ;;  %v181_v27 = vpop.permute.xlu0 %180 }
 0x124   : > { %v193_v28 = vsel %vm151_vm0, %v179_v26, %v835_v2  ;;  %v194_v29 = vsel %vm151_vm0, %v181_v27, %v829_v1 }
 0x125   : > { %214 = vrot.lane.b32.xlu1 %v193_v28, %s698_s17  ;;  %216 = vrot.lane.b32.xlu0 %v194_v29, %s698_s17 }
 0x127   : > { %v183_v30 = vpop.permute.xlu1 %182  ;;  %v185_v31 = vpop.permute.xlu0 %184 }
 0x128   : > { %v195_v32 = vsel %vm151_vm0, %v183_v30, %v837_v3  ;;  %v196_v33 = vsel %vm151_vm0, %v185_v31, %v843_v4  ;;  %v931_v4 = vadd.s32 4294967295, %v905_v50 }
 0x129   : > { %218 = vrot.lane.b32.xlu1 %v195_v32, %s698_s17  ;;  %220 = vrot.lane.b32.xlu0 %v196_v33, %s698_s17 }
 0x12a   : > { %vm339_vm7 = vcmp.ge.s32.totalorder %v931_v4, 0 }
 0x12b   : > { %v187_v34 = vpop.permute.xlu1 %186  ;;  %v189_v35 = vpop.permute.xlu0 %188 }
 0x12c   : > { %v197_v36 = vsel %vm151_vm0, %v187_v34, %v845_v5  ;;  %v198_v37 = vsel %vm151_vm0, %v189_v35, %v851_v6 }
 0x12d   : > { %222 = vrot.lane.b32.xlu1 %v197_v36, %s698_s17  ;;  %224 = vrot.lane.b32.xlu0 %v198_v37, %s698_s17 }
 0x12f   : > { %v191_v38 = vpop.permute.xlu1 %190 }
 0x130   : > { %v199_v39 = vsel %vm151_vm0, %v191_v38, %v853_v7 }
 0x131   : > { %226 = vrot.lane.b32.xlu1 %v199_v39, %s698_s17  ;;  %272 = vrot.lane.b32.xlu0 %v192_v25, %s699_s27 }
 0x135   : > { %274 = vrot.lane.b32.xlu1 %v193_v28, %s699_s27  ;;  %276 = vrot.lane.b32.xlu0 %v194_v29, %s699_s27 }
 0x139   : > { %278 = vrot.lane.b32.xlu1 %v195_v32, %s699_s27  ;;  %280 = vrot.lane.b32.xlu0 %v196_v33, %s699_s27 }
 0x13d   : > { %282 = vrot.lane.b32.xlu1 %v197_v36, %s699_s27  ;;  %284 = vrot.lane.b32.xlu0 %v198_v37, %s699_s27 }
 0x141   : > { %286 = vrot.lane.b32.xlu1 %v199_v39, %s699_s27 }
 0x193   : > { %v213_v42 = vpop.permute.xlu0 %212 }
 0x194   : > { %v236_v51 = vsel %vm899_vm3, %v213_v42, 0.0 }
 0x195   : > { %v244_v55 = vmul.f32 0.25, %v236_v51 }
 0x197   : > { %v215_v44 = vpop.permute.xlu1 %214  ;;  %v217_v45 = vpop.permute.xlu0 %216  ;;  %v260_v12 = vadd.f32 %v252_v54, %v244_v55 }
 0x198   : > { %v237_v57 = vsel %vm899_vm3, %v215_v44, 0.0  ;;  %v238_v60 = vsel %vm899_vm3, %v217_v45, 0.0 }
 0x199   : > { %v245_v10 = vmul.f32 0.25, %v237_v57  ;;  %v246_v13 = vmul.f32 0.25, %v238_v60 }
 0x19b   : > { %v219_v46 = vpop.permute.xlu1 %218  ;;  %v221_v47 = vpop.permute.xlu0 %220  ;;  %v261_v21 = vadd.f32 %v253_v56, %v245_v10  ;;  %v262_v24 = vadd.f32 %v254_v59, %v246_v13 }
 0x19c   : > { %v239_v8 = vsel %vm899_vm3, %v219_v46, 0.0  ;;  %v240_v2 = vsel %vm899_vm3, %v221_v47, 0.0 }
 0x19d   : > { %v247_v16 = vmul.f32 0.25, %v239_v8  ;;  %v248_v5 = vmul.f32 0.25, %v240_v2 }
 0x19f   : > { %v223_v52 = vpop.permute.xlu1 %222  ;;  %v225_v53 = vpop.permute.xlu0 %224  ;;  %v263_v27 = vadd.f32 %v255_v61, %v247_v16  ;;  %v264_v28 = vadd.f32 %v256_v62, %v248_v5 }
 0x1a0   : > { %v241_v17 = vsel %vm899_vm3, %v223_v52, 0.0  ;;  %v242_v22 = vsel %vm899_vm3, %v225_v53, 0.0 }
 0x1a1   : > { %v249_v25 = vmul.f32 0.25, %v241_v17  ;;  %v250_v33 = vmul.f32 0.25, %v242_v22 }
 0x1a3   : > { %v227_v63 = vpop.permute.xlu1 %226  ;;  %v273_v0 = vpop.permute.xlu0 %272  ;;  %v265_v41 = vadd.f32 %v257_v9, %v249_v25 }
 0x1a4   : > { %v296_v1 = vsel %vm270_vm4, %v273_v0, 0.0  ;;  %v243_v29 = vsel %vm899_vm3, %v227_v63, 0.0 }
 0x1a5   : > { %v304_v3 = vmul.f32 0.25, %v296_v1  ;;  %v251_v42 = vmul.f32 0.25, %v243_v29 }
 0x1a7   : > { %v275_v6 = vpop.permute.xlu1 %274  ;;  %v277_v18 = vpop.permute.xlu0 %276  ;;  %v312_v19 = vadd.f32 %v304_v3, %v260_v12 }
 0x1a8   : > { %v297_v20 = vsel %vm270_vm4, %v275_v6, 0.0  ;;  %v298_v7 = vsel %vm270_vm4, %v277_v18, 0.0 }
 0x1a9   : > { %v305_v23 = vmul.f32 0.25, %v297_v20  ;;  %v306_v26 = vmul.f32 0.25, %v298_v7  ;;  %v320_v34 = vrot.slane %v312_v19, 7  ;;  %v377_v37 = vrot.slane %v312_v19, 1 }
 0x1aa   : > { %v361_v56 = vmul.f32 0.5, %v312_v19 }
 0x1ab   : > { %v313_v30 = vadd.f32 %v305_v23, %v261_v21  ;;  %v279_v31 = vpop.permute.xlu1 %278  ;;  %v281_v32 = vpop.permute.xlu0 %280  ;;  %v314_v44 = vadd.f32 %v306_v26, %v262_v24  ;;  %v266_v26 = vadd.f32 %v928_v11, %v250_v33 }
 0x1ac   : > { %v299_v35 = vsel %vm270_vm4, %v279_v31, 0.0  ;;  %v300_v36 = vsel %vm270_vm4, %v281_v32, 0.0 }
 0x1ad   : > { %v324_v38 = vrot.slane %v313_v30, 7  ;;  %v381_v39 = vrot.slane %v313_v30, 1  ;;  %v307_v40 = vmul.f32 0.25, %v299_v35  ;;  %v362_v43 = vmul.f32 0.5, %v313_v30 }
 0x1ae   : > { %v308_v48 = vmul.f32 0.25, %v300_v36  ;;  %v321_v62 = vrot.slane %v314_v44, 7  ;;  %v363_v63 = vmul.f32 0.5, %v314_v44  ;;  %v378_v0 = vrot.slane %v314_v44, 1 }
 0x1af   : > { %v329_v45 = vsel %vm328_vm5, %v320_v34, %v324_v38  ;;  %v333_v46 = vsel %vm328_vm5, %v324_v38, %v320_v34  ;;  %v390_v47 = vsel %vm385_vm6, %v381_v39, %v377_v37  ;;  %v283_v51 = vpop.permute.xlu1 %282  ;;  %v386_v54 = vsel %vm385_vm6, %v377_v37, %v381_v39  ;;  %v285_v60 = vpop.permute.xlu0 %284 }
 0x1b0   : > { %v345_v52 = vsel %vm339_vm7, %v333_v46, 0.0  ;;  %v354_v53 = vmul.f32 0.25, %v329_v45  ;;  %v403_v55 = vsel %vm399_vm8, %v390_v47, 0.0  ;;  %v315_v59 = vadd.f32 %v307_v40, %v263_v27 }
 0x1b1   : > { %v353_v57 = vmul.f32 0.25, %v345_v52  ;;  %v411_v58 = vmul.f32 0.25, %v403_v55  ;;  %v410_v2 = vmul.f32 0.25, %v386_v54  ;;  %v316_v3 = vadd.f32 %v308_v48, %v264_v28 }
 0x1b2   : > { %v370_v61 = vadd.f32 %v362_v43, %v354_v53  ;;  %v325_v9 = vrot.slane %v315_v59, 7  ;;  %v382_v1 = vrot.slane %v315_v59, 1  ;;  %v301_v12 = vsel %vm270_vm4, %v283_v51, 0.0 }
 0x1b3   : > { %v369_v8 = vadd.f32 %v361_v56, %v353_v57  ;;  %v302_v13 = vsel %vm270_vm4, %v285_v60, 0.0  ;;  %v364_v6 = vmul.f32 0.5, %v315_v59  ;;  %v287_v18 = vpop.permute.xlu1 %286  ;;  %v309_v24 = vmul.f32 0.25, %v301_v12 }
 0x1b4   : > { %v419_v10 = vadd.f32 %v411_v58, %v370_v61  ;;  %v330_v5 = vsel %vm328_vm5, %v321_v62, %v325_v9  ;;  %v334_v17 = vsel %vm328_vm5, %v325_v9, %v321_v62  ;;  %v387_v7 = vsel %vm385_vm6, %v378_v0, %v382_v1 }
 0x1b5   : > { %v418_v16 = vadd.f32 %v410_v2, %v369_v8  ;;  %v347_v19 = vsel %vm339_vm7, %v334_v17, 0.0  ;;  %v356_v20 = vmul.f32 0.25, %v330_v5  ;;  %v391_v21 = vsel %vm385_vm6, %v382_v1, %v378_v0 }
 0x1b6   : > { %428 = vst.msk [vmem:[%s978_s28 + $0x8] sm:$0xff] %vm426_vm9, %v419_v10  ;;  %v355_v22 = vmul.f32 0.25, %v347_v19  ;;  %v405_v23 = vsel %vm399_vm8, %v391_v21, 0.0  ;;  %v310_v25 = vmul.f32 0.25, %v302_v13  ;;  %v303_v29 = vsel %vm270_vm4, %v287_v18, 0.0 }
 0x1b7   : > { %427 = vst.msk [vmem:[%s978_s28] sm:$0xff] %vm426_vm9, %v418_v16  ;;  %v372_v27 = vadd.f32 %v364_v6, %v356_v20  ;;  %v413_v28 = vmul.f32 0.25, %v405_v23  ;;  %v412_v31 = vmul.f32 0.25, %v387_v7  ;;  %v317_v32 = vadd.f32 %v309_v24, %v265_v41 }
 0x1b8   : > { %v371_v30 = vadd.f32 %v363_v63, %v355_v22  ;;  %v311_v34 = vmul.f32 0.25, %v303_v29  ;;  %v267_v35 = vadd.f32 %v934_v14, %v251_v42  ;;  %v322_v37 = vrot.slane %v316_v3, 7 }
 0x1b9   : > { %v421_v36 = vadd.f32 %v413_v28, %v372_v27  ;;  %v379_v38 = vrot.slane %v316_v3, 1  ;;  %v326_v40 = vrot.slane %v317_v32, 7  ;;  %v383_v43 = vrot.slane %v317_v32, 1 }
 0x1ba   : > { %v420_v39 = vadd.f32 %v412_v31, %v371_v30  ;;  %v318_v11 = vadd.f32 %v310_v25, %v266_v26  ;;  %v365_v33 = vmul.f32 0.5, %v316_v3  ;;  %v319_v44 = vadd.f32 %v311_v34, %v267_v35 }
 0x1bb   : > { %430 = vst.msk [vmem:[%s978_s28 + $0x18] sm:$0xff] %vm426_vm9, %v421_v36  ;;  %v331_v49 = vsel %vm328_vm5, %v322_v37, %v326_v40  ;;  %v335_v41 = vsel %vm328_vm5, %v326_v40, %v322_v37  ;;  %v388_v14 = vsel %vm385_vm6, %v379_v38, %v383_v43  ;;  %v392_v42 = vsel %vm385_vm6, %v383_v43, %v379_v38 }
 0x1bc   : > { %429 = vst.msk [vmem:[%s978_s28 + $0x10] sm:$0xff] %vm426_vm9, %v420_v39  ;;  %v349_v45 = vsel %vm339_vm7, %v335_v41, 0.0  ;;  %v358_v46 = vmul.f32 0.25, %v331_v49  ;;  %v366_v47 = vmul.f32 0.5, %v317_v32  ;;  %v407_v48 = vsel %vm399_vm8, %v392_v42, 0.0 }
 0x1bd   : > { %v357_v51 = vmul.f32 0.25, %v349_v45  ;;  %v415_v52 = vmul.f32 0.25, %v407_v48  ;;  %v323_v53 = vrot.slane %v318_v11, 7  ;;  %v327_v54 = vrot.slane %v319_v44, 7 }
 0x1be   : > { %v374_v55 = vadd.f32 %v366_v47, %v358_v46  ;;  %v414_v56 = vmul.f32 0.25, %v388_v14  ;;  %v380_v57 = vrot.slane %v318_v11, 1  ;;  %v384_v58 = vrot.slane %v319_v44, 1 }
 0x1bf   : > { %v373_v59 = vadd.f32 %v365_v33, %v357_v51  ;;  %v332_v60 = vsel %vm328_vm5, %v323_v53, %v327_v54  ;;  %v336_v61 = vsel %vm328_vm5, %v327_v54, %v323_v53  ;;  %v368_v62 = vmul.f32 0.5, %v319_v44 }
 0x1c0   : > { %v423_v63 = vadd.f32 %v415_v52, %v374_v55  ;;  %v351_v0 = vsel %vm339_vm7, %v336_v61, 0.0  ;;  %v360_v8 = vmul.f32 0.25, %v332_v60  ;;  %v389_v2 = vsel %vm385_vm6, %v380_v57, %v384_v58 }
 0x1c1   : > { %v422_v9 = vadd.f32 %v414_v56, %v373_v59  ;;  %v367_v1 = vmul.f32 0.5, %v318_v11  ;;  %v359_v10 = vmul.f32 0.25, %v351_v0  ;;  %v393_v3 = vsel %vm385_vm6, %v384_v58, %v380_v57 }
 0x1c2   : > { %432 = vst.msk [vmem:[%s978_s28 + $0x28] sm:$0xff] %vm426_vm9, %v423_v63  ;;  %v376_v4 = vadd.f32 %v368_v62, %v360_v8  ;;  %v409_v12 = vsel %vm399_vm8, %v393_v3, 0.0  ;;  %v416_v16 = vmul.f32 0.25, %v389_v2 }
 0x1c3   : > { %431 = vst.msk [vmem:[%s978_s28 + $0x20] sm:$0xff] %vm426_vm9, %v422_v9  ;;  %v375_v13 = vadd.f32 %v367_v1, %v359_v10  ;;  %v417_v5 = vmul.f32 0.25, %v409_v12 }
 0x1c5   : > { %v424_v50 = vadd.f32 %v416_v16, %v375_v13  ;;  %v425_v17 = vadd.f32 %v417_v5, %v376_v4 }
 0x1c7   : > { %433 = vst.msk [vmem:[%s978_s28 + $0x30] sm:$0xff] %vm426_vm9, %v424_v50  ;;  %434 = vst.msk [vmem:[%s978_s28 + $0x38] sm:$0xff] %vm426_vm9, %v425_v17 }
 0x1c8   : > { %639 = shalt.err (!%p636_p2)
}
 0x1c9   : > { %s640_s20 = scalar_lea.hbm %s1033_s5, 1024  ;;  %s644_s24 = scalar_lea.hbm %s1084_s1, 2048 }
 0x1ca   : > { %p641_p4 = scmp.ne.s32.totalorder %s1033_s5, %s640_s20  ;;  %p645_p9 = scmp.lt.u32.totalorder %s1033_s5, %s1084_s1 }
 0x1cb   : > { %p646_p1 = scmp.lt.u32.totalorder %s644_s24, %s640_s20  ;;  %p648_p6 = scmp.lt.u32.totalorder %s640_s20, %s1033_s5 }
 0x1cc   : > { %p642_p5 = pnand %p641_p4, %p1093_p11 }
 0x1cd   : > { %p647_p3 = por %p646_p1, %p645_p9 }
 0x1ce   : > { %p643_p7 = pneg %p642_p5 }
 0x1cf   : > { %p649_p12 = por %p648_p6, %p647_p3 }
 0x1d1   : > { %p650_p13 = pnand %p649_p12, %p643_p7 }
 0x1d3   : > { %653 = shalt.err (!%p650_p13)
}
 0x1d4   : > { %s701_s25 = smov 128   ;;  %s702_s17 = smov 8  }
 0x1d5   : > { %545 = dma.vmem_to_hbm [thread:$0]  (%p1093_p11), %s1035_s2, 1024, %s1033_s5, %s436_s10, %s701_s25, %s701_s25, %s702_s17  }
 0x1d6 PF: > { %s465_s27 = sand.u32 1, %s680_s6   ;;  %p1094_p8 = scmp.ne.s32.totalorder %s1089_s19, 0 }
 0x1d7   : > { %p1095_p10 = scmp.ge.s32.totalorder %s692_s9, 2  ;;  %s466_s28 = scalar_lea.sflag [#allocation4], %s465_s27 }
 0x1d9   : > { %p552_p0 = pnand %p1095_p10, %p1094_p8 }
 0x1db   : > { %675 = dma.done.wait (!%p552_p0), %s466_s28, 1024  }
 0x1dc   : > { %677 = vsyncadd (!%p552_p0), %s466_s28, 4294966272  ;;  %p14_p2 = scmp.ge.s32.totalorder %s738_s12, 4   ;;  %s1096_s6 = smov %s684_s7 }
 0x1dd   : > { %s1097_s7 = smov %s688_s8  ;;  %s1098_s8 = smov %s750_s15 }
 0x1de   : > { %s1099_s9 = smov %s738_s12  ;;  %16 = sbr.rel (!%p14_p2) target bundleno = 5 (0x5), region = 69 }
 0x1e5   :  { %471 = vsyncpa [#allocation3], 1 }
 0x1e6   :  { %473 = vsyncpa [#allocation3 + $0x1], 1 }
 0x1e7   :  { %474 = vsyncpa [#allocation4], 1 }
 0x1e8   :  { %476 = vsyncpa [#allocation4 + $0x1], 1 }

</bundles_post_ra>
